<compile_context>
chip_gen: v5e
topology: v5e:2x2
jax: 0.10.0
libtpu: 0.0.40
codegen_flags: <defaults>
</compile_context>

<pallas_src>
import jax
import jax.numpy as jnp
from jax.experimental import pallas as pl
from jax.experimental.pallas import tpu as pltpu


# ----------------------------------------------------------------------------
# Kernels
# ----------------------------------------------------------------------------
def _rnn_step_kernel(ls_ref, wt_ref, b_ref, wf_ref, bcb_ref, out_ref, state_ref):
    """Single recurrent step.  ls_ref may have batch dim 1 (broadcast) or B."""
    x = jnp.broadcast_to(ls_ref[...], state_ref.shape)          # (B, book)
    # Two independent MXU dots (no serial dependency between them).
    out_ref[...] = (
        jnp.dot(x, wf_ref[...], preferred_element_type=jnp.float32) + bcb_ref[...]
    ).astype(out_ref.dtype)
    state_ref[...] = (
        jnp.dot(x, wt_ref[...], preferred_element_type=jnp.float32) + b_ref[...]
    ).astype(state_ref.dtype)
    # out_conv is nn.Identity() -> no-op


def _rnn_rollout_kernel(init_ref, wt_ref, b_ref, wf_ref, bcb_ref,
                        out_ref, final_state_ref, state_vmem):
    """Fused T-step rollout; state lives in VMEM scratch across grid steps."""
    t = pl.program_id(0)

    @pl.when(t == 0)
    def _():
        state_vmem[...] = jnp.broadcast_to(init_ref[...], state_vmem.shape)

    x = state_vmem[...]                                          # state_{t-1}
    # output_t = state_{t-1} @ W_fused + b_cb   (== this_state_t @ code_book)
    out_ref[...] = (
        jnp.dot(x, wf_ref[...], preferred_element_type=jnp.float32) + bcb_ref[...]
    ).astype(out_ref.dtype)
    # this_state_t = state_{t-1} @ W^T + b
    new_state = jnp.dot(x, wt_ref[...], preferred_element_type=jnp.float32) + b_ref[...]
    state_vmem[...] = new_state

    @pl.when(t == pl.num_programs(0) - 1)
    def _():
        final_state_ref[...] = new_state.astype(final_state_ref.dtype)


# ----------------------------------------------------------------------------
# Wrappers
# ----------------------------------------------------------------------------
def rnn_module_forward(last_state, batch_size, params):
    """Pallas implementation of RNNModule.forward (single step).

    last_state : (B, 1, book_size) f32 or None
    returns (output (B, 1, hidden_dim*64), this_state (B, 1, book_size))
    """
    book_size = params["next_state_w"].shape[0]
    D = params["w_fused"].shape[-1]

    if last_state is None:
        B = batch_size
        ls2d = params["start_state"].reshape(1, book_size)   # broadcast inside kernel
    else:
        B = last_state.shape[0]
        ls2d = last_state.reshape(B, book_size)

    out2d, state2d = pl.pallas_call(
        _rnn_step_kernel,
        out_shape=(
            jax.ShapeDtypeStruct((B, D), jnp.float32),
            jax.ShapeDtypeStruct((B, book_size), jnp.float32),
        ),
        in_specs=[
            pl.BlockSpec(ls2d.shape, lambda: (0, 0)),
            pl.BlockSpec((book_size, book_size), lambda: (0, 0)),
            pl.BlockSpec((1, book_size), lambda: (0, 0)),
            pl.BlockSpec((book_size, D), lambda: (0, 0)),
            pl.BlockSpec((1, D), lambda: (0, 0)),
        ],
        out_specs=(
            pl.BlockSpec((B, D), lambda: (0, 0)),
            pl.BlockSpec((B, book_size), lambda: (0, 0)),
        ),
    )(ls2d, params["next_state_w_T"], params["next_state_b_2d"],
      params["w_fused"], params["b_cb"])

    return out2d.reshape(B, 1, D), state2d.reshape(B, 1, book_size)


def rnn_module_rollout(last_state, batch_size, num_steps, params):
    """Fused multi-step rollout: equivalent to calling forward() num_steps times,
    feeding this_state back in, but as a single pallas_call (state stays in VMEM).

    returns (outputs (num_steps, B, 1, D), final_state (B, 1, book_size))
    """
    book_size = params["next_state_w"].shape[0]
    D = params["w_fused"].shape[-1]

    if last_state is None:
        B = batch_size
        ls2d = params["start_state"].reshape(1, book_size)
    else:
        B = last_state.shape[0]
        ls2d = last_state.reshape(B, book_size)

    outs, final_state = pl.pallas_call(
        _rnn_rollout_kernel,
        out_shape=(
            jax.ShapeDtypeStruct((num_steps, B, D), jnp.float32),
            jax.ShapeDtypeStruct((B, book_size), jnp.float32),
        ),
        grid_spec=pltpu.PrefetchScalarGridSpec(
            num_scalar_prefetch=0,
            grid=(num_steps,),
            in_specs=[
                pl.BlockSpec(ls2d.shape, lambda t: (0, 0)),
                pl.BlockSpec((book_size, book_size), lambda t: (0, 0)),
                pl.BlockSpec((1, book_size), lambda t: (0, 0)),
                pl.BlockSpec((book_size, D), lambda t: (0, 0)),
                pl.BlockSpec((1, D), lambda t: (0, 0)),
            ],
            out_specs=(
                pl.BlockSpec((None, B, D), lambda t: (t, 0, 0)),      # per-step output
                pl.BlockSpec((B, book_size), lambda t: (0, 0)),       # resident final state
            ),
            scratch_shapes=[pltpu.VMEM((B, book_size), jnp.float32)],
        ),
        compiler_params=pltpu.CompilerParams(
            dimension_semantics=("arbitrary",),   # recurrence: state carried across steps
        ),
    )(ls2d, params["next_state_w_T"], params["next_state_b_2d"],
      params["w_fused"], params["b_cb"])

    return outs.reshape(num_steps, B, 1, D), final_state.reshape(B, 1, book_size)


# ----------------------------------------------------------------------------
# Params (static weight prep happens here, once, not per forward call)
# ----------------------------------------------------------------------------
def init_params(key, hidden_dim, book_size):
    """Deterministic synthetic parameter init (shapes match the PyTorch module)."""
    D = hidden_dim * 64
    k_cb, k_w, k_b = jax.random.split(key, 3)
    # code_book stands in for the dataset-loaded model_param tensor.
    code_book = jax.random.normal(k_cb, (1, book_size, D), dtype=jnp.float32)
    # nn.Linear(book_size, book_size): uniform(-1/sqrt(in), 1/sqrt(in))
    bound = 1.0 / (book_size ** 0.5)
    w = jax.random.uniform(k_w, (book_size, book_size), jnp.float32, -bound, bound)
    b = jax.random.uniform(k_b, (book_size,), jnp.float32, -bound, bound)
    start_state = jnp.zeros((1, 1, book_size), dtype=jnp.float32)

    # ---- static prep (moved out of the per-call hot path) ----
    cb2d = code_book.reshape(book_size, D)
    w_t = w.T                                   # (book, book) for x @ W^T
    w_fused = w_t @ cb2d                        # (book, D):  x @ W_fused == (x@W^T) @ CB
    b_cb = (b @ cb2d).reshape(1, D)             # (1, D)   :  bias term folded through CB

    return {
        "code_book": code_book,
        "next_state_w": w,
        "next_state_b": b,
        "start_state": start_state,
        # precomputed static tensors used by the kernels
        "next_state_w_T": w_t,
        "next_state_b_2d": b.reshape(1, book_size),
        "w_fused": w_fused,
        "b_cb": b_cb,
    }


# ----------------------------------------------------------------------------
# Self-test
# ----------------------------------------------------------------------------
if __name__ == "__main__":
    hidden_dim = 4          # -> output feature dim D = hidden_dim * 64 = 256
    book_size = 16
    batch_size = 2
    num_steps = 4

    key = jax.random.PRNGKey(0)
    params = init_params(key, hidden_dim, book_size)

    # Single-step: last_state None -> start_state broadcast; then feed back.
    out0, state0 = rnn_module_forward(None, batch_size, params)
    out1, state1 = rnn_module_forward(state0, batch_size, params)

    # Fused multi-step rollout (one pallas_call for all steps).
    outs_roll, state_roll = rnn_module_rollout(None, batch_size, num_steps, params)

    jax.block_until_ready((out0, state0, out1, state1, outs_roll, state_roll))

    # Pure-JAX reference (original, unfused math).
    def ref_forward(last_state):
        if last_state is None:
            last_state = jnp.tile(params["start_state"], (batch_size, 1, 1))
        ts = last_state @ params["next_state_w"].T + params["next_state_b"]
        out = ts @ params["code_book"]
        return out, ts

    r_out0, r_state0 = ref_forward(None)
    r_out1, r_state1 = ref_forward(r_state0)
    assert jnp.allclose(out0, r_out0, atol=1e-4, rtol=1e-4)
    assert jnp.allclose(state0, r_state0, atol=1e-4, rtol=1e-4)
    assert jnp.allclose(out1, r_out1, atol=1e-4, rtol=1e-4)
    assert jnp.allclose(state1, r_state1, atol=1e-4, rtol=1e-4)

    r_outs = []
    ls = None
    for _ in range(num_steps):
        o, ls = ref_forward(ls)
        r_outs.append(o)
    r_outs = jnp.stack(r_outs, 0)
    assert jnp.allclose(outs_roll, r_outs, atol=1e-4, rtol=1e-4)
    assert jnp.allclose(state_roll, ls, atol=1e-4, rtol=1e-4)

    print("KERNEL_OK")
</pallas_src>

<mosaic_0001>
module attributes {stable_mosaic.version = 11 : i64} {
  func.func @_rnn_step_kernel(%arg0: memref<1x16xf32, #tpu.memory_space<vmem>>, %arg1: memref<16x16xf32, #tpu.memory_space<vmem>>, %arg2: memref<1x16xf32, #tpu.memory_space<vmem>>, %arg3: memref<16x256xf32, #tpu.memory_space<vmem>>, %arg4: memref<1x256xf32, #tpu.memory_space<vmem>>, %arg5: memref<2x256xf32, #tpu.memory_space<vmem>>, %arg6: memref<2x16xf32, #tpu.memory_space<vmem>>) attributes {dimension_semantics = [], scalar_prefetch = 0 : i64, scratch_operands = 0 : i64, tpu.core_type = #tpu.core_type<tc>} {
    %c0 = arith.constant 0 : index
    %c0_0 = arith.constant 0 : index
    %0 = vector.load %arg0[%c0, %c0_0] : memref<1x16xf32, #tpu.memory_space<vmem>>, vector<1x16xf32>
    %1 = vector.shape_cast %0 : vector<1x16xf32> to vector<1x16xf32>
    %2 = vector.broadcast %1 : vector<1x16xf32> to vector<2x16xf32>
    %c0_1 = arith.constant 0 : index
    %c0_2 = arith.constant 0 : index
    %3 = vector.load %arg3[%c0_1, %c0_2] : memref<16x256xf32, #tpu.memory_space<vmem>>, vector<16x256xf32>
    %cst = arith.constant dense<0.000000e+00> : vector<2x256xf32>
    %4 = tpu.matmul %2, %3, %cst {dimension_numbers = #tpu.dot_dimension_numbers<[1], [0], [0], [1], [0, 0, 1, 1], [], []>} : vector<2x16xf32>, vector<16x256xf32>, vector<2x256xf32> -> vector<2x256xf32>
    %c0_3 = arith.constant 0 : index
    %c0_4 = arith.constant 0 : index
    %5 = vector.load %arg4[%c0_3, %c0_4] : memref<1x256xf32, #tpu.memory_space<vmem>>, vector<1x256xf32>
    %6 = vector.broadcast %5 : vector<1x256xf32> to vector<2x256xf32>
    %7 = arith.addf %4, %6 : vector<2x256xf32>
    %c0_5 = arith.constant 0 : index
    %c0_6 = arith.constant 0 : index
    %8 = vector.load %arg5[%c0_5, %c0_6] : memref<2x256xf32, #tpu.memory_space<vmem>>, vector<2x256xf32>
    tpu.vector_store %arg5[%c0_5, %c0_6], %7 {strides = array<i32>} : memref<2x256xf32, #tpu.memory_space<vmem>>, vector<2x256xf32>,
    %c0_7 = arith.constant 0 : index
    %c0_8 = arith.constant 0 : index
    %9 = vector.load %arg1[%c0_7, %c0_8] : memref<16x16xf32, #tpu.memory_space<vmem>>, vector<16x16xf32>
    %cst_9 = arith.constant dense<0.000000e+00> : vector<2x16xf32>
    %10 = tpu.matmul %2, %9, %cst_9 {dimension_numbers = #tpu.dot_dimension_numbers<[1], [0], [0], [1], [0, 0, 1, 1], [], []>} : vector<2x16xf32>, vector<16x16xf32>, vector<2x16xf32> -> vector<2x16xf32>
    %c0_10 = arith.constant 0 : index
    %c0_11 = arith.constant 0 : index
    %11 = vector.load %arg2[%c0_10, %c0_11] : memref<1x16xf32, #tpu.memory_space<vmem>>, vector<1x16xf32>
    %12 = vector.broadcast %11 : vector<1x16xf32> to vector<2x16xf32>
    %13 = arith.addf %10, %12 : vector<2x16xf32>
    %c0_12 = arith.constant 0 : index
    %c0_13 = arith.constant 0 : index
    %14 = vector.load %arg6[%c0_12, %c0_13] : memref<2x16xf32, #tpu.memory_space<vmem>>, vector<2x16xf32>
    tpu.vector_store %arg6[%c0_12, %c0_13], %13 {strides = array<i32>} : memref<2x16xf32, #tpu.memory_space<vmem>>, vector<2x16xf32>,
    return
  }
}

</mosaic_0001>

<bundles_post_ra>
// kernel: tpu_custom_call.1
= control target key start
LH: loop header
LB: loop body
LE: loop exit
PB: predicated region body
PF: predicated region fallthrough
CT: control target
= control target key end

     0   :  { %12 = vsyncpa [#allocation3], 0  ;;  %s401_s0 = inlined_call_operand.hbm [shape: f32[1,16], index: 0, kind: input, shape index: {}]   ;;  %s402_s1 = inlined_call_operand.hbm [shape: f32[16,16], index: 1, kind: input, shape index: {}]   ;;  %s403_s2 = inlined_call_operand.vmem [shape: f32[1,16], index: 2, kind: input, shape index: {}]   ;;  %s404_s3 = inlined_call_operand.hbm [shape: f32[16,256], index: 3, kind: input, shape index: {}]   ;;  %s405_s4 = inlined_call_operand.vmem [shape: f32[1,256], index: 4, kind: input, shape index: {}]   ;;  %s406_s5 = inlined_call_operand.hbm [shape: f32[2,256], index: 5, kind: output, shape index: {0}]   ;;  %s407_s6 = inlined_call_operand.hbm [shape: f32[2,16], index: 6, kind: output, shape index: {1}]  }
   0x1   :  { %13 = vsyncpa [#allocation6], 0 }
   0x2   :  { %14 = vsyncpa [#allocation4], 0  ;;  %s31_s23 = sshll.u32 %s402_s1, 4  ;;  %s32_s23 = int_to_ptr.hbm [resolvable:$true] %s31_s23 }
   0x3   :  { %15 = vsyncpa [#allocation10], 0  ;;  %s336_s24 = smov [#allocation5]   ;;  %s21_s28 = sshll.u32 %s401_s0, 4  ;;  %s22_s28 = int_to_ptr.hbm [resolvable:$true] %s21_s28 }
   0x4   :  { %s33_s25 = sshll.u32 %s336_s24, 4  ;;  %s337_s29 = smov 128   ;;  %s34_s25 = int_to_ptr.vmem [resolvable:$true] %s33_s25 }
   0x5   :  { %s338_s30 = smov 8   ;;  %s339_s7 = smov [#allocation2]  }
   0x6   :  { %39 = dma.hbm_to_vmem [thread:$0]  %s32_s23, 256, %s34_s25, [#allocation6], %s337_s29, %s337_s29, %s338_s30  }
   0x7   :  { %s23_s8 = sshll.u32 %s339_s7, 4  ;;  %s46_s11 = sshll.u32 %s404_s3, 4  ;;  %s24_s8 = int_to_ptr.vmem [resolvable:$true] %s23_s8  ;;  %s47_s11 = int_to_ptr.hbm [resolvable:$true] %s46_s11 }
   0x8   :  { %26 = dma.hbm_to_vmem [thread:$0]  %s22_s28, 16, %s24_s8, [#allocation3]  }
   0x9   :  { %s340_s1 = smov [#allocation7]   ;;  %s341_s13 = smov 256  }
   0xa   :  { %s48_s12 = sshll.u32 %s340_s1, 4  ;;  %s342_s14 = smov 16   ;;  %s49_s12 = int_to_ptr.vmem [resolvable:$true] %s48_s12 }
   0xb   :  { %54 = dma.hbm_to_vmem [thread:$0]  %s47_s11, 512, %s49_s12, [#allocation6], %s341_s13, %s341_s13, %s342_s14  }
   0xc   :  { %328 = dma.done.wait [#allocation3], 16  }
   0xd   :  { %329 = vsyncadd [#allocation3], 4294967280 }
   0xe   :  { %330 = dma.done.wait [#allocation6], 768  }
   0xf   :  { %331 = vsyncadd [#allocation6], 4294966528  ;;  %v133_v0 = vld [vmem:[#allocation5 + $0x8] sm:$0xff]  ;;  %v132_v1 = vld [vmem:[#allocation5] sm:$0xff]  ;;  %vm82_vm0 = vcmask 130048   ;;  %s343_s15 = smov [#allocation8]  }
  0x10   :  { %v75_v2 = vld [vmem:[#allocation7 + $0x18] sm:$0xff]  ;;  %152 = vmatpush.msra.mxu2 %v133_v0  ;;  %v206_v3 = vld [vmem:[#allocation2] ss:$0 sm:$0xff]  ;;  %v74_v4 = vld [vmem:[#allocation7 + $0x10] sm:$0xff]  ;;  %s165_s16 = sshll.u32 %s343_s15, 4  ;;  %s167_s19 = sshll.u32 %s406_s5, 4  ;;  %s166_s16 = int_to_ptr.vmem [resolvable:$true] %s165_s16  ;;  %s168_s19 = int_to_ptr.hbm [resolvable:$true] %s167_s19 }
  0x11   :  { %119 = vmatpush.msra.mxu1 %v75_v2  ;;  %99 = vmatpush.msra.mxu0 %v74_v4  ;;  %v73_v5 = vld [vmem:[#allocation7 + $0x8] sm:$0xff]  ;;  %v72_v6 = vld [vmem:[#allocation7] sm:$0xff]  ;;  %vm128_vm1 = vcmask 1041408   ;;  %s344_s22 = smov [#allocation9]   ;;  %s178_s25 = sshll.u32 %s407_s6, 4  ;;  %vm158_vm2 = vcmask 123904   ;;  %s179_s25 = int_to_ptr.hbm [resolvable:$true] %s178_s25 }
  0x12   :  { %153 = vmatpush.msra.mxu2 %v132_v1  ;;  %v76_v7 = vld [vmem:[%s405_s4] sm:$0x3]  ;;  %s176_s4 = sshll.u32 %s344_s22, 4  ;;  %s177_s4 = int_to_ptr.vmem [resolvable:$true] %s176_s4 }
  0x13   :  { %120 = vmatpush.msra.mxu1 %v73_v5  ;;  %196 = vmatmul.msk.f32.vlgmr.msra.gmra.mxu2 %vm82_vm0, %v206_v3  ;;  %v79_v8 = vperm.slane %v76_v7, 1  ;;  %v78_v9 = vperm.slane %v76_v7, 0  ;;  %v207_v15 = vld [vmem:[%s403_s2] ss:$0 sm:$0xff] }
  0x14   :  { %195 = vmatmul.msk.f32.vlgmr.msra.gmra.mxu1 %vm82_vm0, %v206_v3  ;;  %100 = vmatpush.msra.mxu0 %v72_v6 }
  0x15   :  { %194 = vmatmul.msk.f32.vlgmr.msra.gmra.mxu0 %vm82_vm0, %v206_v3 }
  0x91   :  { %v122_v10 = vpop.f32.mrf.mxu1 }
  0x92   :  { %v123_v11 = vadd.f32 %v122_v10, %v79_v8  ;;  %v102_v12 = vpop.f32.mrf.mxu0 }
  0x93   :  { %v103_v14 = vadd.f32 %v102_v12, %v78_v9 }
  0x94   :  { %v127_v13 = vrot.slane %v123_v11, 6 }
  0x96   :  { %v129_v16 = vsel %vm128_vm1, %v103_v14, %v127_v13  ;;  %v155_v17 = vpop.f32.mrf.mxu2 }
  0x97   :  { %131 = vst [vmem:[#allocation8] sm:$0xf] %v129_v16  ;;  %v156_v18 = vadd.f32 %v207_v15, %v155_v17 }
  0x98   :  { %170 = dma.vmem_to_hbm [thread:$0]  %s166_s16, 64, %s168_s19, [#allocation4]  }
  0x99   :  { %159 = vst.msk [vmem:[#allocation9] sm:$0x3] %vm158_vm2, %v156_v18 }
  0x9a   :  { %181 = dma.vmem_to_hbm [thread:$0]  %s177_s4, 32, %s179_s25, [#allocation10]  }
  0x9b   :  { %332 = dma.done.wait [#allocation4], 64  }
  0x9c   :  { %333 = vsyncadd [#allocation4], 4294967232 }
  0x9d   :  { %334 = dma.done.wait [#allocation10], 32  }
  0x9e   :  { %335 = vsyncadd [#allocation10], 4294967264 }
  0x9f   :  { %190 = vsyncpa [#allocation3], 1 }
  0xa0   :  { %191 = vsyncpa [#allocation6], 1 }
  0xa1   :  { %192 = vsyncpa [#allocation4], 1 }
  0xa2   :  { %193 = vsyncpa [#allocation10], 1 }

</bundles_post_ra>
